<compile_context>
chip_gen: v7x
topology: tpu7x:2x2x1
jax: 0.10.0
libtpu: 0.0.40
codegen_flags: <defaults>
</compile_context>

<pallas_src>
import jax
import jax.numpy as jnp
from jax.experimental import pallas as pl
from jax.experimental.pallas import tpu as pltpu

_LANE = 128

# Older jax releases used TPUCompilerParams; current uses CompilerParams.
_CompilerParams = getattr(pltpu, "CompilerParams", None) or getattr(
    pltpu, "TPUCompilerParams"
)


def _tpu_config():
    """(num_core_partials, target_tile_bytes, axis0_semantics) per TPU generation."""
    kind = ""
    try:
        kind = jax.devices()[0].device_kind.lower()
    except Exception:
        pass
    core_parallel = getattr(pltpu, "CORE_PARALLEL", "parallel")
    if "7" in kind:                          # v7x: 2 TCs/chip, ~3.2 TB/s per TC
        return 2, 8 << 20, core_parallel
    if "v6" in kind:                         # v6e: single TC, 32 MiB scoped VMEM default
        return 1, 8 << 20, "arbitrary"
    if "v5e" in kind or "lite" in kind:      # v5e: single TC, 16 MiB scoped VMEM default
        return 1, 4 << 20, "arbitrary"
    if "v5p" in kind or "v5" in kind or "v4" in kind:   # megacore: 2 TCs
        return 2, 4 << 20, "parallel"
    if "v2" in kind or "v3" in kind:         # small VMEM parts
        return 1, 2 << 20, "arbitrary"
    return 1, 4 << 20, "arbitrary"


def _make_partial_sum_kernel(rows, tile_rows, steps, need_mask):
    """Kernel over grid (p, steps); o_ref is a per-core (1,128) f32 accumulator."""

    def kernel(x_ref, o_ref):
        @pl.when(pl.program_id(1) == 0)
        def _init():
            o_ref[...] = jnp.zeros_like(o_ref)

        x = x_ref[...].astype(jnp.float32)                 # (tile_rows, 128)
        if need_mask:
            # Logical (unclamped) row index of every element's row; rows at or
            # beyond `rows` (ragged tail / clamped overflow blocks) contribute 0.
            block = pl.program_id(0) * steps + pl.program_id(1)
            row0 = block * tile_rows
            row_ids = row0 + jax.lax.broadcasted_iota(jnp.int32, x.shape, 0)
            x = jnp.where(row_ids < rows, x, 0.0)

        o_ref[...] += jnp.sum(x, axis=0, keepdims=True)    # (1, 128) per-lane sums

    return kernel


def reduce_mean(x, *, num_core_partials=None, target_tile_bytes=None):
    """Mean over all elements of x; the O(n) streaming reduction runs in Pallas."""
    x = jnp.asarray(x)
    n = x.size
    if n == 0:
        return jnp.full((), jnp.nan, dtype=x.dtype)

    auto_p, auto_tile, axis0_sem = _tpu_config()
    p = auto_p if num_core_partials is None else max(1, int(num_core_partials))
    tile_bytes = auto_tile if target_tile_bytes is None else int(target_tile_bytes)

    flat = x.reshape(-1)                      # free bitcast of a contiguous array
    itemsize = flat.dtype.itemsize
    rows = n // _LANE
    tail = n - rows * _LANE                   # < 128 elements

    # Tiny tail (< one lane row): summed directly and added to the partials.
    tail_sum = jnp.sum(flat[rows * _LANE:].astype(jnp.float32)) if tail else 0.0

    if rows == 0:
        total = tail_sum
    else:
        main = flat[: rows * _LANE] if tail else flat   # zero-copy when n % 128 == 0
        x2 = main.reshape(rows, _LANE)

        # Rows per grid step (~tile_bytes of input). Multiple of 32 sublanes so the
        # block stays aligned for any packed dtype; single full-extent block when
        # the whole array fits in one tile.
        t_cap = max(32, (tile_bytes // (_LANE * itemsize)) // 32 * 32)
        tile_rows = rows if rows <= t_cap else t_cap
        num_blocks = -(-rows // tile_rows)
        p = max(1, min(p, num_blocks))
        steps = -(-num_blocks // p)
        covered_rows = p * steps * tile_rows
        need_mask = covered_rows > rows        # static: ragged / overflow tiles exist

        kernel = _make_partial_sum_kernel(rows, tile_rows, steps, need_mask)

        last_block = num_blocks - 1
        in_spec = pl.BlockSpec(
            (tile_rows, _LANE),
            # Clamp so overflow blocks (fully masked inside the kernel) never start
            # a DMA outside the array.
            lambda c, i: (jnp.minimum(c * steps + i, last_block), 0),
        )
        out_spec = pl.BlockSpec((1, _LANE), lambda c, i: (c, 0))

        # Double-buffered input + accumulator, with headroom; explicit so bigger
        # tiles are safe on every generation's default scoped-VMEM limit.
        vmem_limit = int(
            min(32 << 20, max(16 << 20, 2 * tile_rows * _LANE * itemsize + (2 << 20)))
        )

        partials = pl.pallas_call(
            kernel,
            out_shape=jax.ShapeDtypeStruct((p, _LANE), jnp.float32),
            grid=(p, steps),
            in_specs=[in_spec],
            out_specs=out_spec,
            compiler_params=_CompilerParams(
                dimension_semantics=(
                    axis0_sem if p > 1 else "arbitrary",
                    "arbitrary",
                ),
                vmem_limit_bytes=vmem_limit,
            ),
        )(x2)

        total = jnp.sum(partials) + tail_sum

    # n is a plain Python int -> no traced constants captured; true-count divisor.
    return (total / n).astype(x.dtype)


if __name__ == "__main__":
    key = jax.random.PRNGKey(0)

    # Spec case: rank-4 f32 (NCHW-ish), n = 2048 (exactly 16 lane-rows, no tail).
    x = jax.random.normal(key, (2, 4, 16, 16), dtype=jnp.float32)
    result = jax.block_until_ready(reduce_mean(x))
    ref = jnp.mean(x)
    assert jnp.allclose(result, ref, atol=1e-5, rtol=1e-5), (result, ref)

    # Extra coverage: force tiny tiles -> multi-step grid with a ragged, masked
    # last tile (no padding anywhere).
    x2 = jax.random.normal(jax.random.PRNGKey(1), (3, 4, 16, 32), dtype=jnp.float32)
    r2 = jax.block_until_ready(reduce_mean(x2, target_tile_bytes=16 * 1024))
    assert jnp.allclose(r2, jnp.mean(x2), atol=1e-5, rtol=1e-5), (r2, jnp.mean(x2))

    # Extra coverage: n % 128 != 0 -> sub-lane tail summed in the wrapper.
    x3 = jax.random.normal(jax.random.PRNGKey(2), (2, 3, 5, 7), dtype=jnp.float32)
    r3 = jax.block_until_ready(reduce_mean(x3))
    assert jnp.allclose(r3, jnp.mean(x3), atol=1e-5, rtol=1e-5), (r3, jnp.mean(x3))

    print("KERNEL_OK")
</pallas_src>

<mosaic_0001>
module attributes {stable_mosaic.version = 11 : i64} {
  func.func @kernel(%arg0: i32, %arg1: i32, %arg2: memref<16x128xf32, #tpu.memory_space<vmem>>, %arg3: memref<1x128xf32, #tpu.memory_space<vmem>>) attributes {dimension_semantics = [#tpu.dimension_semantics<arbitrary>, #tpu.dimension_semantics<arbitrary>], iteration_bounds = array<i64: 1, 1>, scalar_prefetch = 0 : i64, scratch_operands = 0 : i64, tpu.core_type = #tpu.core_type<tc>, window_params = [{transform_indices = @transform_0, window_bounds = array<i64: 16, 128>}, {transform_indices = @transform_1, window_bounds = array<i64: 1, 128>}]} {
    %c0_i32 = arith.constant 0 : i32
    %0 = arith.cmpi eq, %arg1, %c0_i32 : i32
    %1 = arith.extui %0 : i1 to i32
    %c0_i32_0 = arith.constant 0 : i32
    %2 = arith.cmpi ne, %1, %c0_i32_0 : i32
    scf.if %2 {
      %cst_6 = arith.constant 0.000000e+00 : f32
      %9 = vector.broadcast %cst_6 : f32 to vector<1x128xf32>
      %c0_7 = arith.constant 0 : index
      %c0_8 = arith.constant 0 : index
      %10 = vector.load %arg3[%c0_7, %c0_8] : memref<1x128xf32, #tpu.memory_space<vmem>>, vector<1x128xf32>
      tpu.vector_store %arg3[%c0_7, %c0_8], %9 {strides = array<i32>} : memref<1x128xf32, #tpu.memory_space<vmem>>, vector<1x128xf32>,
    } else {
    }
    %c0 = arith.constant 0 : index
    %c0_1 = arith.constant 0 : index
    %3 = vector.load %arg2[%c0, %c0_1] : memref<16x128xf32, #tpu.memory_space<vmem>>, vector<16x128xf32>
    %c0_2 = arith.constant 0 : index
    %c0_3 = arith.constant 0 : index
    %4 = vector.load %arg3[%c0_2, %c0_3] : memref<1x128xf32, #tpu.memory_space<vmem>>, vector<1x128xf32>
    %cst = arith.constant dense<0.000000e+00> : vector<128xf32>
    %5 = vector.multi_reduction <add>, %3, %cst [0] : vector<16x128xf32> to vector<128xf32>
    %6 = vector.shape_cast %5 : vector<128xf32> to vector<1x128xf32>
    %7 = arith.addf %4, %6 : vector<1x128xf32>
    %c0_4 = arith.constant 0 : index
    %c0_5 = arith.constant 0 : index
    %8 = vector.load %arg3[%c0_4, %c0_5] : memref<1x128xf32, #tpu.memory_space<vmem>>, vector<1x128xf32>
    tpu.vector_store %arg3[%c0_4, %c0_5], %7 {strides = array<i32>} : memref<1x128xf32, #tpu.memory_space<vmem>>, vector<1x128xf32>,
    return
  }
  func.func @transform_0(%arg0: i32, %arg1: i32) -> (i32, i32) {
    %c1_i32 = arith.constant 1 : i32
    %0 = arith.muli %arg0, %c1_i32 : i32
    %1 = arith.addi %0, %arg1 : i32
    %c0_i32 = arith.constant 0 : i32
    %2 = arith.minsi %1, %c0_i32 : i32
    %c0_i32_0 = arith.constant 0 : i32
    %c0_i32_1 = arith.constant 0 : i32
    return %2, %c0_i32_0 : i32, i32
  }
  func.func @transform_1(%arg0: i32, %arg1: i32) -> (i32, i32) {
    %c0_i32 = arith.constant 0 : i32
    %c0_i32_0 = arith.constant 0 : i32
    return %arg0, %c0_i32 : i32, i32
  }
}

</mosaic_0001>

<bundles_post_ra>
// kernel: tpu_custom_call.1
= control target key start
LH: loop header
LB: loop body
LE: loop exit
PB: predicated region body
PF: predicated region fallthrough
CT: control target
= control target key end

     0   :  { %6 = vsyncpa [#allocation3], 0  ;;  %s159_s0 = inlined_call_operand.hbm [shape: f32[16,128], index: 0, kind: input, shape index: {}]   ;;  %s160_s1 = inlined_call_operand.hbm [shape: f32[1,128], index: 1, kind: output, shape index: {}]  }
   0x1   :  { %7 = vsyncpa [#allocation4], 0  ;;  %s120_s6 = smov [#allocation2]   ;;  %s72_s10 = scalar_lea.hbm %s159_s0, 256 }
   0x2   :  { %s19_s7 = sshll.u32 %s120_s6, 4  ;;  %p73_p0 = scmp.ne.s32.totalorder %s159_s0, %s72_s10  ;;  %s20_s7 = int_to_ptr.vmem [resolvable:$true] %s19_s7 }
   0x3   :  { %p76_p1 = scmp.lt.u32.totalorder %s72_s10, %s159_s0 }
   0x5   :  { %p78_p2 = pnand %p76_p1, %p73_p0 }
   0x7   :  { %81 = shalt.err (!%p78_p2)
}
   0x8   :  { %s82_s15 = scalar_lea.vmem %s20_s7, 256  ;;  %p87_p4 = scmp.lt.s32.totalorder %s20_s7, %s20_s7 }
   0x9   :  { %p83_p3 = scmp.ne.s32.totalorder %s20_s7, %s82_s15  ;;  %p88_p5 = scmp.lt.s32.totalorder %s82_s15, %s82_s15 }
   0xb   :  { %p89_p6 = por %p88_p5, %p87_p4 }
   0xd   :  { %p90_p7 = pnand %p89_p6, %p83_p3 }
   0xf   :  { %93 = shalt.err (!%p90_p7)
}
  0x10   :  { %s121_s16 = smov 128   ;;  %s122_s17 = smov 8  }
  0x11   :  { %25 = dma.hbm_to_vmem [thread:$0]  %s159_s0, 256, %s20_s7, [#allocation3], %s121_s16, %s121_s16, %s122_s17  }
  0x12   :  { %116 = dma.done.wait [#allocation3], 256  }
  0x13   :  { %117 = vsyncadd [#allocation3], 4294967040  ;;  %v123_v0 = vmov 0.0   ;;  %v38_v1 = vld [vmem:[#allocation2] sm:$0xff]  ;;  %v39_v2 = vld [vmem:[#allocation2 + $0x8] sm:$0xff]  ;;  %s124_s20 = smov [#allocation5]  }
  0x14   :  { %37 = vst [vmem:[#allocation5] sm:$0x1] %v123_v0  ;;  %v41_v3 = vadd.f32 %v39_v2, %v38_v1  ;;  %s56_s21 = sshll.u32 %s124_s20, 4  ;;  %s57_s21 = int_to_ptr.vmem [resolvable:$true] %s56_s21 }
  0x15   :  { %s94_s0 = scalar_lea.vmem %s57_s21, 16  ;;  %s98_s22 = scalar_lea.vmem %s57_s21, 32 }
  0x16   :  { %v42_v4 = vrot.slane %v41_v3, 4  ;;  %p95_p8 = scmp.ne.s32.totalorder %s57_s21, %s94_s0  ;;  %p99_p9 = scmp.lt.s32.totalorder %s57_s21, %s57_s21 }
  0x17   :  { %p100_p10 = scmp.lt.s32.totalorder %s98_s22, %s94_s0 }
  0x18   :  { %v43_v5 = vadd.f32 %v42_v4, %v41_v3 }
  0x19   :  { %p101_p11 = por %p100_p10, %p99_p9 }
  0x1a   :  { %v44_v6 = vrot.slane %v43_v5, 2 }
  0x1b   :  { %v40_v9 = vld [vmem:[#allocation5] sm:$0x1]  ;;  %p102_p12 = pnand %p101_p11, %p95_p8 }
  0x1c   :  { %v45_v7 = vadd.f32 %v44_v6, %v43_v5 }
  0x1e   :  { %v46_v8 = vrot.slane %v45_v7, 1 }
  0x20   :  { %v47_v10 = vadd.f32 %v46_v8, %v45_v7 }
  0x22   :  { %v48_v11 = vadd.f32 %v47_v10, %v40_v9 }
  0x24   :  { %49 = vst [vmem:[#allocation5] sm:$0x1] %v48_v11 }
  0x25   :  { %105 = shalt.err (!%p102_p12)
}
  0x26   :  { %s106_s25 = scalar_lea.hbm %s160_s1, 16 }
  0x27   :  { %p107_p13 = scmp.ne.s32.totalorder %s160_s1, %s106_s25  ;;  %p110_p0 = scmp.lt.u32.totalorder %s106_s25, %s160_s1 }
  0x29   :  { %p112_p1 = pnand %p110_p0, %p107_p13 }
  0x2b   :  { %115 = shalt.err (!%p112_p1)
}
  0x2c   :  { %59 = dma.vmem_to_hbm [thread:$0]  %s57_s21, 16, %s160_s1, [#allocation4]  }
  0x2d   :  { %118 = dma.done.wait [#allocation4], 16  }
  0x2e   :  { %119 = vsyncadd [#allocation4], 4294967280 }
  0x2f   :  { %63 = vsyncpa [#allocation3], 1 }
  0x30   :  { %64 = vsyncpa [#allocation4], 1 }

</bundles_post_ra>
